<compile_context>
chip_gen: v7x
topology: tpu7x:2x2x1
jax: 0.10.0
libtpu: 0.0.40
codegen_flags: <defaults>
</compile_context>

<pallas_src>
import functools

import jax
import jax.numpy as jnp
from jax.experimental import pallas as pl
from jax.experimental.pallas import tpu as pltpu


def _emb_ln_kernel(ids_ref,            # SMEM (B*S_pad,) int32   (scalar prefetch)
                   tt_ref,             # VMEM (tile_s, 1) int32
                   pos_ref,            # VMEM (tile_s, E)
                   type_ref,           # VMEM (T, E)
                   gamma_ref,          # VMEM (1, E)
                   beta_ref,           # VMEM (1, E)
                   word_hbm,           # HBM  (V, E)  raw ref (memory_space=pl.ANY)
                   out_ref,            # VMEM (tile_s, E)
                   gbuf_ref,           # VMEM scratch (tile_s, E): gathered word rows
                   dma_sem,            # scalar DMA semaphore
                   *, eps, type_vocab_size, tile_s, s_pad):
    s = pl.program_id(0)
    b = pl.program_id(1)
    base = b * s_pad + s * tile_s        # flattened offset of this tile's tokens

    # 1) Issue one row DMA per token: word_table[id] -> gather scratch.
    #    All copies share one DMA semaphore; they stay in flight while the VPU
    #    prepares the position + token-type part below.
    def _issue(i, carry):
        row = ids_ref[base + i]
        pltpu.make_async_copy(
            word_hbm.at[pl.ds(row, 1), :],
            gbuf_ref.at[pl.ds(i, 1), :],
            dma_sem,
        ).start()
        return carry

    jax.lax.fori_loop(0, tile_s, _issue, 0, unroll=False)

    # 2) Position + token-type select (pure VPU work, overlaps with the DMAs).
    rest = pos_ref[...].astype(jnp.float32)
    type_rows = type_ref[...].astype(jnp.float32)
    if type_vocab_size == 1:
        rest = rest + type_rows[0:1, :]
    elif type_vocab_size == 2:
        tt = tt_ref[...]                                   # (tile_s, 1) int32
        rest = rest + jnp.where(tt == 0, type_rows[0:1, :], type_rows[1:2, :])
    else:
        # General (rare) path; ids >= type_vocab_size contribute zero.
        tt = tt_ref[...]
        t_emb = jnp.zeros_like(rest)
        for t in range(type_vocab_size):
            t_emb = t_emb + jnp.where(tt == t, type_rows[t:t + 1, :], 0.0)
        rest = rest + t_emb

    # 3) Wait for all row gathers (one wait per issued copy; sizes match).
    def _wait(i, carry):
        pltpu.make_async_copy(
            word_hbm.at[pl.ds(0, 1), :],
            gbuf_ref.at[pl.ds(0, 1), :],
            dma_sem,
        ).wait()
        return carry

    jax.lax.fori_loop(0, tile_s, _wait, 0, unroll=False)

    # 4) Sum + single-pass LayerNorm over the lane (E) axis, f32 math.
    emb = gbuf_ref[...].astype(jnp.float32) + rest
    e_dim = emb.shape[-1]
    inv_e = jnp.float32(1.0 / e_dim)
    s1 = jnp.sum(emb, axis=-1, keepdims=True)
    s2 = jnp.sum(emb * emb, axis=-1, keepdims=True)
    mean = s1 * inv_e
    var = jnp.maximum(s2 * inv_e - mean * mean, 0.0)      # biased var, clamp cancellation
    inv_std = jax.lax.rsqrt(var + eps)
    gamma = gamma_ref[...].astype(jnp.float32)            # (1, E) lane broadcast
    beta = beta_ref[...].astype(jnp.float32)
    out = (emb - mean) * inv_std * gamma + beta

    # Dropout: identity in eval mode.
    out_ref[...] = out.astype(out_ref.dtype)


def _pick_tile_s(s, max_tile=1024, align=8):
    """Return (tile_s, s_pad).

    tile_s is either the full S (always legal for BlockSpec) or an `align`-
    aligned divisor of s_pad; s_pad >= s is what the wrapper pads the sequence
    to when no aligned divisor exists.
    """
    if s <= max_tile:
        return s, s
    hi = max_tile - (max_tile % align)
    for t in range(hi, align - 1, -align):
        if s % t == 0:
            return t, s
    s_pad = ((s + max_tile - 1) // max_tile) * max_tile
    return max_tile, s_pad


def squeezebert_embeddings(input_ids, token_type_ids,
                           word_table, pos_table, type_table,
                           gamma, beta, *, eps=1e-12):
    """JAX wrapper reproducing SqueezeBertEmbeddings.forward (eval mode,
    position_ids defaulting to arange(seq_len))."""
    B, S = input_ids.shape
    V, E = word_table.shape
    T = type_table.shape[0]

    if token_type_ids is None:
        token_type_ids = jnp.zeros((B, S), dtype=jnp.int32)

    # Clamp ids so the in-kernel row DMA can never go OOB (jnp.take semantics;
    # torch would raise for out-of-range ids).
    input_ids = jnp.clip(input_ids.astype(jnp.int32), 0, V - 1)
    token_type_ids = token_type_ids.astype(jnp.int32)

    tile_s, s_pad = _pick_tile_s(S)
    if s_pad != S:
        pad = s_pad - S
        input_ids = jnp.pad(input_ids, ((0, 0), (0, pad)))          # id 0: valid gather
        token_type_ids = jnp.pad(token_type_ids, ((0, 0), (0, pad)))

    ids_flat = input_ids.reshape(B * s_pad)          # scalar-prefetch stream (SMEM)
    tt3 = token_type_ids.reshape(B, s_pad, 1)

    # position_ids default to arange(S); rows delivered per-tile by BlockSpec.
    pos_emb = pos_table[:S]
    if s_pad != S:
        pos_emb = jnp.pad(pos_emb, ((0, s_pad - S), (0, 0)))

    # Seq tiles outermost so the position tile stays resident across the B
    # inner iterations; each step is self-contained -> both axes "parallel".
    grid = (s_pad // tile_s, B)

    kernel = functools.partial(_emb_ln_kernel, eps=eps, type_vocab_size=T,
                               tile_s=tile_s, s_pad=s_pad)

    out = pl.pallas_call(
        kernel,
        out_shape=jax.ShapeDtypeStruct((B, s_pad, E), word_table.dtype),
        grid_spec=pltpu.PrefetchScalarGridSpec(
            num_scalar_prefetch=1,
            grid=grid,
            in_specs=[
                pl.BlockSpec((None, tile_s, 1), lambda s, b, ids: (b, s, 0)),  # token types
                pl.BlockSpec((tile_s, E), lambda s, b, ids: (s, 0)),           # position rows
                pl.BlockSpec((T, E), lambda s, b, ids: (0, 0)),                # type table
                pl.BlockSpec((1, E), lambda s, b, ids: (0, 0)),                # gamma
                pl.BlockSpec((1, E), lambda s, b, ids: (0, 0)),                # beta
                pl.BlockSpec(memory_space=pl.ANY),                             # word table (HBM)
            ],
            out_specs=pl.BlockSpec((None, tile_s, E), lambda s, b, ids: (b, s, 0)),
            scratch_shapes=[
                pltpu.VMEM((tile_s, E), word_table.dtype),   # gathered word rows
                pltpu.SemaphoreType.DMA(()),                 # shared gather semaphore
            ],
        ),
        compiler_params=pltpu.CompilerParams(
            dimension_semantics=("parallel", "parallel"),    # megacore on v7x
            vmem_limit_bytes=32 * 1024 * 1024,               # footprint + headroom
        ),
    )(ids_flat, tt3, pos_emb, type_table,
      gamma.reshape(1, E), beta.reshape(1, E), word_table)

    if s_pad != S:
        out = out[:, :S, :]
    return out


def _reference(input_ids, token_type_ids, word_table, pos_table, type_table,
               gamma, beta, eps=1e-12):
    B, S = input_ids.shape
    emb = (word_table[input_ids]
           + pos_table[jnp.arange(S)][None, :, :]
           + type_table[token_type_ids])
    mean = jnp.mean(emb, axis=-1, keepdims=True)
    var = jnp.mean((emb - mean) ** 2, axis=-1, keepdims=True)
    return (emb - mean) * jax.lax.rsqrt(var + eps) * gamma + beta


if __name__ == "__main__":
    # Small, SqueezeBERT-like synthetic config (E=128 keeps the output lane-dense).
    vocab_size = 64
    max_position_embeddings = 64
    type_vocab_size = 2
    embedding_size = 128         # == hidden_size
    pad_token_id = 0
    layer_norm_eps = 1e-12
    B, S = 2, 8

    key = jax.random.PRNGKey(0)
    k_w, k_p, k_t, k_g, k_b, k_ids, k_tt = jax.random.split(key, 7)

    word_table = 0.02 * jax.random.normal(
        k_w, (vocab_size, embedding_size), dtype=jnp.float32)
    # nn.Embedding(padding_idx=pad_token_id) zero-initializes that row.
    word_table = word_table.at[pad_token_id].set(0.0)
    pos_table = 0.02 * jax.random.normal(
        k_p, (max_position_embeddings, embedding_size), dtype=jnp.float32)
    type_table = 0.02 * jax.random.normal(
        k_t, (type_vocab_size, embedding_size), dtype=jnp.float32)
    gamma = 1.0 + 0.1 * jax.random.normal(k_g, (embedding_size,), dtype=jnp.float32)
    beta = 0.05 * jax.random.normal(k_b, (embedding_size,), dtype=jnp.float32)

    input_ids = jax.random.randint(k_ids, (B, S), 0, vocab_size, dtype=jnp.int32)
    token_type_ids = jax.random.randint(k_tt, (B, S), 0, type_vocab_size,
                                        dtype=jnp.int32)

    out = squeezebert_embeddings(input_ids, token_type_ids,
                                 word_table, pos_table, type_table,
                                 gamma, beta, eps=layer_norm_eps)
    out = jax.block_until_ready(out)

    ref = _reference(input_ids, token_type_ids, word_table, pos_table,
                     type_table, gamma, beta, eps=layer_norm_eps)
    assert out.shape == (B, S, embedding_size)
    assert jnp.allclose(out, ref, rtol=1e-5, atol=1e-5), "mismatch vs reference"

    print("KERNEL_OK")
</pallas_src>

<mosaic_0001>
module attributes {stable_mosaic.version = 11 : i64} {
  func.func @_emb_ln_kernel(%arg0: i32, %arg1: i32, %arg2: memref<16xi32, #tpu.memory_space<smem>>, %arg3: memref<1x8x1xi32, #tpu.memory_space<vmem>>, %arg4: memref<8x128xf32, #tpu.memory_space<vmem>>, %arg5: memref<2x128xf32, #tpu.memory_space<vmem>>, %arg6: memref<1x128xf32, #tpu.memory_space<vmem>>, %arg7: memref<1x128xf32, #tpu.memory_space<vmem>>, %arg8: memref<64x128xf32, #tpu.memory_space<any>>, %arg9: memref<1x8x128xf32, #tpu.memory_space<vmem>>, %arg10: memref<8x128xf32, #tpu.memory_space<vmem>>, %arg11: memref<!tpu.dma_semaphore, #tpu.memory_space<semaphore_mem>>) attributes {dimension_semantics = [#tpu.dimension_semantics<parallel>, #tpu.dimension_semantics<parallel>], iteration_bounds = array<i64: 1, 2>, scalar_prefetch = 1 : i64, scratch_operands = 2 : i64, tpu.core_type = #tpu.core_type<tc>, window_params = [{transform_indices = @transform_0, window_bounds = array<i64: 1, 8, 1>}, {transform_indices = @transform_1, window_bounds = array<i64: 8, 128>}, {pipeline_mode = #tpu.pipeline_mode<synchronous>, transform_indices = @transform_2, window_bounds = array<i64: 2, 128>}, {pipeline_mode = #tpu.pipeline_mode<synchronous>, transform_indices = @transform_3, window_bounds = array<i64: 1, 128>}, {pipeline_mode = #tpu.pipeline_mode<synchronous>, transform_indices = @transform_4, window_bounds = array<i64: 1, 128>}, {}, {transform_indices = @transform_6, window_bounds = array<i64: 1, 8, 128>}]} {
    %c8_i32 = arith.constant 8 : i32
    %0 = arith.muli %arg1, %c8_i32 : i32
    %c8_i32_0 = arith.constant 8 : i32
    %1 = arith.muli %arg0, %c8_i32_0 : i32
    %2 = arith.addi %0, %1 : i32
    %c0_i32 = arith.constant 0 : i32
    %c8_i32_1 = arith.constant 8 : i32
    %3 = arith.addi %c0_i32, %c8_i32_1 : i32
    %c1_i32 = arith.constant 1 : i32
    scf.for %arg12 = %c0_i32 to %3 step %c1_i32  : i32 {
      %52 = arith.addi %2, %arg12 : i32
      %53 = arith.index_cast %52 : i32 to index
      %54 = memref.load %arg2[%53] : memref<16xi32, #tpu.memory_space<smem>>
      %c0_i32_27 = arith.constant 0 : i32
      %55 = tpu.memref_slice %arg8[%54, %c0_i32_27] : memref<64x128xf32, #tpu.memory_space<any>> -> memref<1x128xf32, #tpu.memory_space<any>>
      %c0_i32_28 = arith.constant 0 : i32
      %56 = tpu.memref_slice %arg10[%arg12, %c0_i32_28] : memref<8x128xf32, #tpu.memory_space<vmem>> -> memref<1x128xf32, #tpu.memory_space<vmem>>
      tpu.enqueue_dma source(%55 : memref<1x128xf32, #tpu.memory_space<any>>) target(%56 : memref<1x128xf32, #tpu.memory_space<vmem>>) target_semaphore(%arg11 : memref<!tpu.dma_semaphore, #tpu.memory_space<semaphore_mem>>)
    }
    %c8_i32_2 = arith.constant 8 : i32
    %c0 = arith.constant 0 : index
    %c0_3 = arith.constant 0 : index
    %4 = vector.load %arg4[%c0, %c0_3] : memref<8x128xf32, #tpu.memory_space<vmem>>, vector<8x128xf32>
    %c0_4 = arith.constant 0 : index
    %c0_5 = arith.constant 0 : index
    %5 = vector.load %arg5[%c0_4, %c0_5] : memref<2x128xf32, #tpu.memory_space<vmem>>, vector<2x128xf32>
    %c0_6 = arith.constant 0 : index
    %c0_7 = arith.constant 0 : index
    %c0_8 = arith.constant 0 : index
    %6 = vector.load %arg3[%c0_6, %c0_7, %c0_8] : memref<1x8x1xi32, #tpu.memory_space<vmem>>, vector<1x8x1xi32>
    %7 = vector.shape_cast %6 : vector<1x8x1xi32> to vector<8x1xi32>
    %c0_i32_9 = arith.constant 0 : i32
    %8 = vector.broadcast %c0_i32_9 : i32 to vector<8x1xi32>
    %9 = arith.cmpi eq, %7, %8 : vector<8x1xi32>
    %10 = vector.extract_strided_slice %5 {offsets = [0, 0], sizes = [1, 128], strides = [1, 1]} : vector<2x128xf32> to vector<1x128xf32>
    %11 = vector.extract_strided_slice %5 {offsets = [1, 0], sizes = [1, 128], strides = [1, 1]} : vector<2x128xf32> to vector<1x128xf32>
    %12 = vector.shape_cast %9 : vector<8x1xi1> to vector<8x1xi1>
    %13 = vector.broadcast %12 : vector<8x1xi1> to vector<8x128xi1>
    %14 = vector.shape_cast %10 : vector<1x128xf32> to vector<1x128xf32>
    %15 = vector.broadcast %14 : vector<1x128xf32> to vector<8x128xf32>
    %16 = vector.shape_cast %11 : vector<1x128xf32> to vector<1x128xf32>
    %17 = vector.broadcast %16 : vector<1x128xf32> to vector<8x128xf32>
    %18 = arith.select %13, %15, %17 : vector<8x128xi1>, vector<8x128xf32>
    %19 = arith.addf %4, %18 : vector<8x128xf32>
    %c0_i32_10 = arith.constant 0 : i32
    %c8_i32_11 = arith.constant 8 : i32
    %20 = arith.addi %c0_i32_10, %c8_i32_11 : i32
    %c1_i32_12 = arith.constant 1 : i32
    scf.for %arg12 = %c0_i32_10 to %20 step %c1_i32_12  : i32 {
      %c0_i32_27 = arith.constant 0 : i32
      %c0_i32_28 = arith.constant 0 : i32
      %52 = tpu.memref_slice %arg8[%c0_i32_27, %c0_i32_28] : memref<64x128xf32, #tpu.memory_space<any>> -> memref<1x128xf32, #tpu.memory_space<any>>
      %c0_i32_29 = arith.constant 0 : i32
      %c0_i32_30 = arith.constant 0 : i32
      %53 = tpu.memref_slice %arg10[%c0_i32_29, %c0_i32_30] : memref<8x128xf32, #tpu.memory_space<vmem>> -> memref<1x128xf32, #tpu.memory_space<vmem>>
      tpu.wait_dma2 semaphore(%arg11 : memref<!tpu.dma_semaphore, #tpu.memory_space<semaphore_mem>>) src(%52 : memref<1x128xf32, #tpu.memory_space<any>>) dst(%53 : memref<1x128xf32, #tpu.memory_space<vmem>>)
    }
    %c0_13 = arith.constant 0 : index
    %c0_14 = arith.constant 0 : index
    %21 = vector.load %arg10[%c0_13, %c0_14] : memref<8x128xf32, #tpu.memory_space<vmem>>, vector<8x128xf32>
    %22 = arith.addf %21, %19 : vector<8x128xf32>
    %cst = arith.constant dense<0.000000e+00> : vector<8xf32>
    %23 = vector.multi_reduction <add>, %22, %cst [1] : vector<8x128xf32> to vector<8xf32>
    %24 = vector.shape_cast %23 : vector<8xf32> to vector<8x1xf32>
    %25 = arith.mulf %22, %22 : vector<8x128xf32>
    %cst_15 = arith.constant dense<0.000000e+00> : vector<8xf32>
    %26 = vector.multi_reduction <add>, %25, %cst_15 [1] : vector<8x128xf32> to vector<8xf32>
    %27 = vector.shape_cast %26 : vector<8xf32> to vector<8x1xf32>
    %cst_16 = arith.constant 7.812500e-03 : f32
    %28 = vector.broadcast %cst_16 : f32 to vector<8x1xf32>
    %29 = arith.mulf %24, %28 : vector<8x1xf32>
    %cst_17 = arith.constant 7.812500e-03 : f32
    %30 = vector.broadcast %cst_17 : f32 to vector<8x1xf32>
    %31 = arith.mulf %27, %30 : vector<8x1xf32>
    %32 = arith.mulf %29, %29 : vector<8x1xf32>
    %33 = arith.subf %31, %32 : vector<8x1xf32>
    %cst_18 = arith.constant 0.000000e+00 : f32
    %34 = vector.broadcast %cst_18 : f32 to vector<8x1xf32>
    %35 = arith.maximumf %33, %34 : vector<8x1xf32>
    %cst_19 = arith.constant 9.99999996E-13 : f32
    %36 = vector.broadcast %cst_19 : f32 to vector<8x1xf32>
    %37 = arith.addf %35, %36 : vector<8x1xf32>
    %38 = math.rsqrt %37 : vector<8x1xf32>
    %c0_20 = arith.constant 0 : index
    %c0_21 = arith.constant 0 : index
    %39 = vector.load %arg6[%c0_20, %c0_21] : memref<1x128xf32, #tpu.memory_space<vmem>>, vector<1x128xf32>
    %c0_22 = arith.constant 0 : index
    %c0_23 = arith.constant 0 : index
    %40 = vector.load %arg7[%c0_22, %c0_23] : memref<1x128xf32, #tpu.memory_space<vmem>>, vector<1x128xf32>
    %41 = vector.broadcast %29 : vector<8x1xf32> to vector<8x128xf32>
    %42 = arith.subf %22, %41 : vector<8x128xf32>
    %43 = vector.broadcast %38 : vector<8x1xf32> to vector<8x128xf32>
    %44 = arith.mulf %42, %43 : vector<8x128xf32>
    %45 = vector.broadcast %39 : vector<1x128xf32> to vector<8x128xf32>
    %46 = arith.mulf %44, %45 : vector<8x128xf32>
    %47 = vector.broadcast %40 : vector<1x128xf32> to vector<8x128xf32>
    %48 = arith.addf %46, %47 : vector<8x128xf32>
    %c0_24 = arith.constant 0 : index
    %c0_25 = arith.constant 0 : index
    %c0_26 = arith.constant 0 : index
    %49 = vector.load %arg9[%c0_24, %c0_25, %c0_26] : memref<1x8x128xf32, #tpu.memory_space<vmem>>, vector<1x8x128xf32>
    %50 = vector.shape_cast %49 : vector<1x8x128xf32> to vector<8x128xf32>
    %51 = vector.shape_cast %48 : vector<8x128xf32> to vector<1x8x128xf32>
    tpu.vector_store %arg9[%c0_24, %c0_25, %c0_26], %51 {strides = array<i32>} : memref<1x8x128xf32, #tpu.memory_space<vmem>>, vector<1x8x128xf32>,
    return
  }
  func.func @transform_0(%arg0: i32, %arg1: i32, %arg2: memref<16xi32, #tpu.memory_space<smem>>) -> (i32, i32, i32) {
    %c0_i32 = arith.constant 0 : i32
    %c0_i32_0 = arith.constant 0 : i32
    return %arg1, %arg0, %c0_i32 : i32, i32, i32
  }
  func.func @transform_1(%arg0: i32, %arg1: i32, %arg2: memref<16xi32, #tpu.memory_space<smem>>) -> (i32, i32) {
    %c0_i32 = arith.constant 0 : i32
    %c0_i32_0 = arith.constant 0 : i32
    return %arg0, %c0_i32 : i32, i32
  }
  func.func @transform_2(%arg0: i32, %arg1: i32, %arg2: memref<16xi32, #tpu.memory_space<smem>>) -> (i32, i32) {
    %c0_i32 = arith.constant 0 : i32
    %c0_i32_0 = arith.constant 0 : i32
    %c0_i32_1 = arith.constant 0 : i32
    return %c0_i32, %c0_i32_0 : i32, i32
  }
  func.func @transform_3(%arg0: i32, %arg1: i32, %arg2: memref<16xi32, #tpu.memory_space<smem>>) -> (i32, i32) {
    %c0_i32 = arith.constant 0 : i32
    %c0_i32_0 = arith.constant 0 : i32
    %c0_i32_1 = arith.constant 0 : i32
    return %c0_i32, %c0_i32_0 : i32, i32
  }
  func.func @transform_4(%arg0: i32, %arg1: i32, %arg2: memref<16xi32, #tpu.memory_space<smem>>) -> (i32, i32) {
    %c0_i32 = arith.constant 0 : i32
    %c0_i32_0 = arith.constant 0 : i32
    %c0_i32_1 = arith.constant 0 : i32
    return %c0_i32, %c0_i32_0 : i32, i32
  }
  func.func @transform_6(%arg0: i32, %arg1: i32, %arg2: memref<16xi32, #tpu.memory_space<smem>>) -> (i32, i32, i32) {
    %c0_i32 = arith.constant 0 : i32
    %c0_i32_0 = arith.constant 0 : i32
    return %arg1, %arg0, %c0_i32 : i32, i32, i32
  }
}

</mosaic_0001>

<bundles_post_ra>
// kernel: tpu_custom_call.1
= control target key start
LH: loop header
LB: loop body
LE: loop exit
PB: predicated region body
PF: predicated region fallthrough
CT: control target
= control target key end

     0   :  { %s912_s0 = inlined_call_operand.vmem [shape: s32[16], index: 0, kind: input, shape index: {}]   ;;  %s913_s1 = inlined_call_operand.vmem [shape: s32[2,8,1], index: 1, kind: input, shape index: {}]   ;;  %s914_s2 = inlined_call_operand.vmem [shape: f32[8,128], index: 2, kind: input, shape index: {}]   ;;  %s915_s3 = inlined_call_operand.vmem [shape: f32[2,128], index: 3, kind: input, shape index: {}]   ;;  %s916_s4 = inlined_call_operand.vmem [shape: f32[1,128], index: 4, kind: input, shape index: {}]   ;;  %s917_s5 = inlined_call_operand.vmem [shape: f32[1,128], index: 5, kind: input, shape index: {}]   ;;  %s918_s6 = inlined_call_operand.hbm [shape: f32[64,128], index: 6, kind: input, shape index: {}]   ;;  %s919_s7 = inlined_call_operand.hbm [shape: f32[2,8,128], index: 7, kind: output, shape index: {}]  }
   0x1   :  { %923 = sst [smem:[#allocation18_spill]] %s913_s1  ;;  %s12_s26 = sshll.u32 %s912_s0, 4  ;;  %s13_s26 = int_to_ptr.vmem [resolvable:$true] %s12_s26 }
   0x2   :  { %s569_s27 = scalar_lea.vmem %s13_s26, 16  ;;  %p574_p1 = scmp.lt.s32.totalorder %s13_s26, %s13_s26 }
   0x3   :  { %p570_p0 = scmp.ne.s32.totalorder %s13_s26, %s569_s27  ;;  %p575_p2 = scmp.lt.s32.totalorder %s569_s27, %s569_s27 }
   0x5   :  { %p576_p3 = por %p575_p2, %p574_p1 }
   0x7   :  { %p577_p4 = pnand %p576_p3, %p570_p0 }
   0x9   :  { %580 = shalt.err (!%p577_p4)  }
   0xa   :  { %s705_s28 = smov [#allocation5]  }
   0xb   :  { %15 = dma.vmem_to_smem %s13_s26, 16, %s705_s28, [#allocation4] }
   0xc   :  { %665 = dma.done.wait [#allocation4], 16 }
   0xd   :  { %666 = vsyncadd [#allocation4], 4294967280 }
   0xe   :  { %17 = sfence }
   0xf   :  { %18 = vsyncpa [#allocation7], 0 }
  0x10   :  { %20 = vsyncpa [#allocation7 + $0x1], 0  ;;  %s752_s29 = smov 0   ;;  %s754_s30 = smov 0  }
  0x11   :  { %s756_s0 = smov 0   ;;  %s758_s8 = smov 0  }
  0x12   :  { %s760_s9 = smov 0   ;;  %s762_s10 = smov 0  }
  0x13 LB: > { %924 = sst [smem:[#allocation15_spill]] %s691_s9  ;;  %s476_s11 = sadd.s32 4294967295, %s695_s10   ;;  %s695_s10 = sphi %s762_s10, %s26_s10   ;;  %s691_s9 = sphi %s760_s9, %s936_s9   ;;  %s687_s8 = sphi %s758_s8, %s935_s8   ;;  %s683_s0 = sphi %s756_s0, %s939_s0   ;;  %s679_s30 = sphi %s754_s30, %s938_s30   ;;  %s675_s29 = sphi %s752_s29, %s937_s29  }
  0x14   : > { %s477_s12 = sadd.s32 4294967294, %s695_s10   ;;  %s35_s13 = sadd.s32 1, %s691_s9 }
  0x15   : > { %s164_s14 = sadd.s32 1, %s683_s0  ;;  %p36_p5 = scmp.ge.s32.totalorder %s35_s13, 2 }
  0x16   : > { %p174_p6 = scmp.ne.s32.totalorder %s683_s0, %s679_s30  ;;  %p175_p7 = scmp.eq.s32.totalorder %s476_s11, 1 }
  0x17   : > { %p180_p8 = scmp.ne.s32.totalorder %s679_s30, %s675_s29  ;;  %s941_s13 = smov (%p36_p5, %s35_s13), 0 }
  0x18   : > { %925 = sst [smem:[#allocation16_spill]] %s941_s13  ;;  %p792_p9 = por %p175_p7, %p174_p6 }
  0x19   : > { %p181_p10 = scmp.eq.s32.totalorder %s477_s12, 1  ;;  %s159_s16 = ssub.s32 %s691_s9, %s941_s13 }
  0x1a   : > { %p481_p11 = scmp.ge.s32.totalorder %s695_s10, 1  ;;  %p162_p12 = scmp.eq.s32.totalorder %s159_s16, 0 }
  0x1b   : > { %p799_p13 = por %p181_p10, %p180_p8  ;;  %p225_p0 = scmp.lt.s32.totalorder %s695_s10, 3 }
  0x1c   : > { %s805_s18 = scalar_select %p162_p12, %s683_s0, %s164_s14  }
  0x1d   : > { %s927_s17 = scalar_select %p799_p13, 1, 0 }
  0x1e   : > { %928 = sst [smem:[#allocation17_spill]] %s805_s18  ;;  %p226_p1 = pnand %p481_p11, %p225_p0 }
  0x1f   : > { %s920_s19 = sand.u32 (!%p226_p1), 1, %s679_s30   ;;  %p259_p2 = scmp.lt.s32.totalorder (!%p226_p1), %s687_s8, 1 }
  0x20   : > { %229 = sbr.rel (%p226_p1) target bundleno = 400 (0x190), region = 40  ;;  %s811_s20 = sshll.u32 (!%p226_p1), %s920_s19, 3 }
  0x21   : > { %s484_s21 = sshll.u32 (!%p226_p1), %s687_s8, 3  ;;  %s929_s1 = sld [smem:[#allocation18_spill]] (!%p226_p1) }
  0x22   : > { %s821_s28 = smov (!%p226_p1), 0  }
  0x27   : > { %s260_s22 = scalar_select %p259_p2, %s687_s8, 1 }
  0x29   : > { %s483_s23 = sshll.u32 %s260_s22, 3 }
  0x2a   : > { %s818_s26 = scalar_lea.vmem %s929_s1, %s483_s23 }
  0x2b LB: >> { %s279_s11 = sadd.s32 %s699_s28, %s484_s21  ;;  %s283_s14 = scalar_lea.vmem [#allocation2], %s699_s28  ;;  %s699_s28 = sphi %s821_s28, %s278_s28  }
  0x2c   : >> { %s280_s12 = sld [smem:[#allocation5 + %s279_s11]]  ;;  %s291_s16 = sshll.u32 %s283_s14, 4  ;;  %s292_s16 = int_to_ptr.vmem [resolvable:$true] %s291_s16 }
  0x2d   : >> { %s583_s13 = scalar_lea.hbm %s918_s6, 1024 }
  0x32   : >> { %s485_s22 = sshll.u32 %s280_s12, 4 }
  0x33   : >> { %s282_s25 = scalar_lea.hbm %s918_s6, %s485_s22 }
  0x34   : >> { %s581_s19 = scalar_lea.hbm %s282_s25, 16  ;;  %p584_p4 = scmp.lt.u32.totalorder %s282_s25, %s918_s6 }
  0x35   : >> { %p582_p3 = scmp.ne.s32.totalorder %s282_s25, %s581_s19  ;;  %p585_p5 = scmp.lt.u32.totalorder %s583_s13, %s581_s19 }
  0x36   : >> { %p587_p7 = scmp.lt.u32.totalorder %s581_s19, %s282_s25 }
  0x37   : >> { %p586_p6 = por %p585_p5, %p584_p4 }
  0x39   : >> { %p588_p8 = por %p587_p7, %p586_p6 }
  0x3b   : >> { %p589_p10 = pnand %p588_p8, %p582_p3 }
  0x3d   : >> { %592 = shalt.err (!%p589_p10)  }
  0x3e   : >> { %s593_s11 = scalar_lea.vmem %s292_s16, 16  ;;  %s706_s12 = smov [#allocation2]  }
  0x3f   : >> { %p594_p11 = scmp.ne.s32.totalorder %s292_s16, %s593_s11  ;;  %s595_s14 = sshll.u32 %s706_s12, 4  ;;  %s596_s14 = int_to_ptr.vmem [resolvable:$false] %s595_s14 }
  0x40   : >> { %s597_s22 = scalar_lea.vmem %s596_s14, 128  ;;  %p598_p12 = scmp.lt.s32.totalorder %s292_s16, %s596_s14 }
  0x41   : >> { %p599_p0 = scmp.lt.s32.totalorder %s597_s22, %s593_s11 }
  0x43   : >> { %p600_p1 = por %p599_p0, %p598_p12 }
  0x45   : >> { %p601_p2 = pnand %p600_p1, %p594_p11 }
  0x47   : >> { %604 = shalt.err (!%p601_p2)  }
  0x48   : >> { %294 = dma.hbm_to_vmem [thread:$0]  %s282_s25, 16, %s292_s16, [#allocation3] }
  0x49   : >> { %s278_s28 = sadd.s32 1, %s699_s28  }
  0x4a   : >> { %p275_p13 = scmp.ge.s32.totalorder %s278_s28, 8  }
  0x4b   : > { %v297_v0 = vld [vmem:[%s818_s26] sm:$0xff] (%p275_p13)  ;;  %v707_v1 = vmov (%p275_p13), 0   ;;  %v304_v3 = vlaneseq (%p275_p13)  ;;  %s701_s19 = smov (%p275_p13), 0  }
  0x4c   : > { %277 = sbr.rel (!%p275_p13) target bundleno = 43 (0x2b), region = 98  ;;  %566 = vset.pattern.permute.xlu0 (%p275_p13), %v707_v1  ;;  %vm298_vm0 = vcmp.eq.s32.totalorder (%p275_p13), %v297_v0, 0  ;;  %v296_v7 = vld [vmem:[%s915_s3] sm:$0x3] (%p275_p13) }
  0x4d   : > { %v299_v2 = vsel (%p275_p13), %vm298_vm0, 1, %v707_v1  ;;  %v305_v4 = vshrl.u32 (%p275_p13), %v304_v3, 7  ;;  %v295_v11 = vld [vmem:[%s914_s2] sm:$0xff] (%p275_p13) }
  0x4e   : > { %301 = vperm.xlu0 (%p275_p13), %566, %v299_v2  }
  0x4f   : > { %v306_v5 = vsub.s32 (%p275_p13), 0, %v305_v4  ;;  %v310_v6 = vsub.s32 (%p275_p13), 1, %v305_v4 }
  0x51   : > { %v307_v8 = vrot.slane (%p275_p13), %v296_v7, %v306_v5  ;;  %v311_v9 = vrot.slane (%p275_p13), %v296_v7, %v310_v6 }
  0xcd   : > { %v302_v10 = vpop.permute.xlu0 %301 }
  0xce   : > { %vm303_vm1 = vcmp.eq.s32.totalorder %v302_v10, 1 }
  0xcf   : > { %v312_v12 = vsel %vm303_vm1, %v307_v8, %v311_v9 }
  0xd0   : > { %v313_v13 = vadd.f32 %v312_v12, %v295_v11 }
  0xd1 LB: >> { %667 = dma.done.wait [#allocation3], 16  ;;  %s703_s19 = sphi %s701_s19, %s319_s19  }
  0xd2   : >> { %668 = vsyncadd [#allocation3], 4294967280  ;;  %s319_s19 = sadd.s32 1, %s703_s19  }
  0xd3   : >> { %p316_p13 = scmp.ge.s32.totalorder %s319_s19, 8  }
  0xd4   : > { %v323_v14 = vld [vmem:[#allocation2] sm:$0xff] (%p316_p13)  ;;  %s489_s16 = sshll.u32 (%p316_p13), %s687_s8, 7  ;;  %s930_s23 = scalar_lea.vmem (%p316_p13), [#allocation6], %s811_s20 }
  0xd5   : > { %318 = sbr.rel (!%p316_p13) target bundleno = 209 (0xd1), region = 109  ;;  %v324_v15 = vadd.f32 (%p316_p13), %v323_v14, %v313_v13  ;;  %v486_v27 = vld [vmem:[%s916_s4] ss:$0 sm:$0xff] (%p316_p13)  ;;  %s371_s24 = sshll.u32 (%p316_p13), %s930_s23, 4  ;;  %s863_s24 = int_to_ptr.vmem [resolvable:$true] %s371_s24 }
  0xd6   : > { %v487_v29 = vld [vmem:[%s917_s5] ss:$0 sm:$0xff] (%p316_p13)  ;;  %s861_s12 = scalar_lea.hbm (%p316_p13), %s919_s7, %s489_s16  ;;  %s931_s14 = smov (%p316_p13), %s930_s23 }
  0xd7   : > { %325 = vadd.xlane.f32.xlu0 (%p316_p13), %v324_v15  ;;  %v327_v16 = vmul.f32 (%p316_p13), %v324_v15, %v324_v15  ;;  %s932_s22 = sand.u32 (%p316_p13), 1, %s679_s30   ;;  %s605_s9 = scalar_lea.vmem (%p316_p13), %s863_s24, 128 }
  0xd8   : > { %s357_s1 = scalar_lea.sflag (%p316_p13), [#allocation7], %s932_s22  ;;  %p606_p3 = scmp.ne.s32.totalorder (%p316_p13), %s863_s24, %s605_s9 }
  0xd9   : > { %s708_s8 = smov (%p316_p13), [#allocation6]  }
  0xda   : > { %p607_p4 = pnand (%p316_p13), %p606_p3, %p792_p9  ;;  %s609_s13 = sshll.u32 (%p316_p13), %s708_s8, 4  ;;  %s610_s13 = int_to_ptr.vmem [resolvable:$false] %s609_s13 }
  0xdb   : > { %328 = vadd.xlane.f32.xlu0 (%p316_p13), %v327_v16  ;;  %s611_s18 = scalar_lea.vmem (%p316_p13), %s610_s13, 256  ;;  %p612_p6 = scmp.lt.s32.totalorder (%p316_p13), %s863_s24, %s610_s13 }
  0xdc   : > { %p608_p5 = pneg %p607_p4  ;;  %p613_p7 = scmp.lt.s32.totalorder %s611_s18, %s605_s9 }
  0xde   : > { %p614_p8 = por %p613_p7, %p612_p6 }
  0xe0   : > { %p615_p10 = pnand %p614_p8, %p608_p5 }
 0x164   : > { %v326_v17 = vpop.xlane.xlu0 %325 }
 0x165   : > { %v330_v18 = vmul.f32 0.0078125, %v326_v17 }
 0x167   : > { %v332_v20 = vmul.f32 %v330_v18, %v330_v18  ;;  %v339_v25 = vsub.f32 %v324_v15, %v330_v18 }
 0x168   : > { %v329_v19 = vpop.xlane.xlu0 %328 }
 0x169   : > { %v331_v21 = vmul.f32 0.0078125, %v329_v19 }
 0x16b   : > { %v333_v22 = vsub.f32 %v331_v21, %v332_v20 }
 0x16d   : > { %v334_v23 = vmax.f32 %v333_v22, 0.0 }
 0x16f   : > { %v335_v24 = vadd.f32 1e-12, %v334_v23 }
 0x171   : > { %567 = vrsqrt.f32 %v335_v24 }
 0x17b   : > { %v568_v26 = vpop.eup %567 }
 0x17c   : > { %v340_v28 = vmul.f32 %v568_v26, %v339_v25 }
 0x17e   : > { %v347_v30 = vmul.f32 %v486_v27, %v340_v28 }
 0x180   : > { %v354_v31 = vadd.f32 %v487_v29, %v347_v30 }
 0x182   : > { %355 = vst [vmem:[%s931_s14] sm:$0xff] %v354_v31 }
 0x183   : > { %618 = shalt.err (!%p615_p10)
}
 0x184   : > { %s619_s20 = scalar_lea.hbm %s861_s12, 128  ;;  %s623_s26 = scalar_lea.hbm %s919_s7, 256 }
 0x185   : > { %p620_p11 = scmp.ne.s32.totalorder %s861_s12, %s619_s20  ;;  %p624_p1 = scmp.lt.u32.totalorder %s861_s12, %s919_s7 }
 0x186   : > { %p625_p2 = scmp.lt.u32.totalorder %s623_s26, %s619_s20  ;;  %p627_p3 = scmp.lt.u32.totalorder %s619_s20, %s861_s12 }
 0x187   : > { %p621_p12 = pnand %p620_p11, %p792_p9 }
 0x188   : > { %p626_p13 = por %p625_p2, %p624_p1 }
 0x189   : > { %p622_p0 = pneg %p621_p12 }
 0x18a   : > { %p628_p4 = por %p627_p3, %p626_p13 }
 0x18c   : > { %p629_p5 = pnand %p628_p4, %p622_p0 }
 0x18e   : > { %632 = shalt.err (!%p629_p5)
}
 0x18f   : > { %493 = dma.vmem_to_hbm [thread:$0]  (%p792_p9), %s863_s24, 128, %s861_s12, %s357_s1  }
 0x190 PF: > { %p499_p6 = scmp.ge.s32.totalorder %s695_s10, 2  ;;  %s383_s16 = sand.u32 1, %s675_s29  }
 0x191   : > { %p933_p7 = scmp.ne.s32.totalorder %s927_s17, 0  ;;  %s384_s23 = scalar_lea.sflag [#allocation7], %s383_s16 }
 0x193   : > { %p496_p8 = pnand %p499_p6, %p933_p7 }
 0x195   : > { %670 = dma.done.wait (!%p496_p8), %s384_s23, 128  }
 0x196   : > { %672 = vsyncadd (!%p496_p8), %s384_s23, 4294967168  ;;  %s26_s10 = sadd.s32 1, %s695_s10   ;;  %s934_s15 = sld [smem:[#allocation17_spill]] }
 0x197   : > { %p23_p10 = scmp.ge.s32.totalorder %s26_s10, 4   ;;  %s935_s8 = sld [smem:[#allocation15_spill]] }
 0x198   : > { %s936_s9 = sld [smem:[#allocation16_spill]]  ;;  %s937_s29 = smov %s679_s30 }
 0x199   : > { %s938_s30 = smov %s683_s0  ;;  %25 = sbr.rel (!%p23_p10) target bundleno = 19 (0x13), region = 120 }
 0x19c   : > { %s939_s0 = smov %s934_s15 }
 0x1a0   :  { %389 = vsyncpa [#allocation7], 1 }
 0x1a1   :  { %391 = vsyncpa [#allocation7 + $0x1], 1 }
 0x1a2   :  { %392 = vsyncmov [#allocation3] }
 0x1a5   :  { %s393_s17 = vpop.sfrf %392 }
 0x1a6   :  { %p492_p9 = scmp.ne.s32.totalorder %s393_s17, 0 }
 0x1a8   :  { %397 = shalt.err (%p492_p9)  }

</bundles_post_ra>
